<compile_context>
chip_gen: v6e
topology: v6e:2x2x1
jax: 0.10.0
libtpu: 0.0.40
codegen_flags: <defaults>
</compile_context>

<pallas_src>
import functools

import jax
import jax.numpy as jnp
import numpy as np
from jax import lax
from jax.experimental import pallas as pl
from jax.experimental.pallas import tpu as pltpu

_LANES = 128
_SUBLANES = 8
_TARGET_ROWS = 8192     # 4 MiB of f32 per input block (~HBM roofline sweet spot)
_MAX_PACK = 256         # max images packed per grid step (bounds output slab)


def _sse_kernel(src_ref, tgt_ref, o_ref, *, groups, rows_per_block, valid_rows,
                mask_rows):
    """Grid = (batch_blocks, row_blocks); row axis is the reduction axis.

    src_ref/tgt_ref : VMEM [bt, rt, 128]   (any real dtype, cast to f32)
    o_ref           : VMEM f32 [bt, 8, 128] — same block index across the row
                      axis, used as the resident per-image SSE accumulator.
    """
    r = pl.program_id(1)

    @pl.when(r == 0)
    def _init():
        o_ref[...] = jnp.zeros_like(o_ref)

    d = src_ref[...].astype(jnp.float32) - tgt_ref[...].astype(jnp.float32)
    sq = d * d

    if mask_rows:
        # The last row block overhangs the true row count: zero the garbage
        # rows (jnp.where = select, so NaN/Inf garbage cannot leak through).
        row0 = r * rows_per_block
        rid = lax.broadcasted_iota(jnp.int32, sq.shape, 1)
        sq = jnp.where(row0 + rid < valid_rows, sq, 0.0)

    bt = sq.shape[0]
    # Free re-tiling on 8-row boundaries; the sum over `groups` is pure VPU
    # vreg adds (no XLU reduce, no broadcast) into the resident slab.
    part = jnp.sum(sq.reshape(bt, groups, _SUBLANES, _LANES), axis=1)
    o_ref[...] = o_ref[...] + part


def _round_up(x, m):
    return ((x + m - 1) // m) * m


@functools.partial(jax.jit, static_argnames=("max_val",))
def psnr_loss(source, target, max_val: float = 256.0):
    """Equivalent of PSNRLoss(max_val).forward(source, target).

    source/target: (..., C, H, W) -> returns loss of shape (...,).
    """
    assert source.shape == target.shape, "source/target shape mismatch"
    assert source.ndim >= 3
    lead = source.shape[:-3]
    C, H, W = source.shape[-3:]
    B = 1
    for s in lead:
        B *= int(s)
    N = C * H * W

    src = source.reshape(B, N)
    tgt = target.reshape(B, N)

    # Lane alignment only.  Zero-padding both inputs identically contributes
    # nothing to the SSE.  Aligned shapes (N % 128 == 0, N >= 1024) pay no copy.
    n_pad = max(_round_up(N, _LANES), _SUBLANES * _LANES)
    if n_pad != N:
        src = jnp.pad(src, ((0, 0), (0, n_pad - N)))
        tgt = jnp.pad(tgt, ((0, 0), (0, n_pad - N)))
    R = n_pad // _LANES

    # v7x dual-core: a single image would leave one TensorCore idle (only one
    # "parallel" batch block).  Split its rows into two pseudo-images via a
    # free, contiguous reshape; partial sums are combined in the epilogue.
    split = 1
    if B == 1 and R % 2 == 0 and R >= 2 * _SUBLANES:
        split = 2
        B, R = 2, R // 2

    src = src.reshape(B, R, _LANES)
    tgt = tgt.reshape(B, R, _LANES)

    # Row tiling: biggest multiple-of-8 tile <= min(R, TARGET).  The last row
    # block may be partial -> masked in-kernel (no jnp.pad round-up).
    rt = min(_TARGET_ROWS, (R // _SUBLANES) * _SUBLANES)
    row_blocks = pl.cdiv(R, rt)
    mask_rows = (row_blocks * rt != R)

    # Batch packing for small images.  bt need not divide B (ragged last batch
    # block; its out-of-bounds rows are never written back).  Cap bt at
    # ceil(B/2) so there are >= 2 parallel batch blocks when B >= 2 (v7x).
    max_bt = max(1, min(_MAX_PACK, _TARGET_ROWS // rt))
    bt = min(B, max_bt)
    if B >= 2:
        bt = min(bt, -(-B // 2))
    bt = max(bt, 1)
    batch_blocks = pl.cdiv(B, bt)

    kernel = functools.partial(
        _sse_kernel, groups=rt // _SUBLANES, rows_per_block=rt,
        valid_rows=R, mask_rows=mask_rows)

    sse_slabs = pl.pallas_call(
        kernel,
        out_shape=jax.ShapeDtypeStruct((B, _SUBLANES, _LANES), jnp.float32),
        grid_spec=pltpu.PrefetchScalarGridSpec(
            num_scalar_prefetch=0,
            grid=(batch_blocks, row_blocks),
            in_specs=[
                pl.BlockSpec((bt, rt, _LANES), lambda b, r: (b, r, 0)),
                pl.BlockSpec((bt, rt, _LANES), lambda b, r: (b, r, 0)),
            ],
            out_specs=pl.BlockSpec((bt, _SUBLANES, _LANES),
                                   lambda b, r: (b, 0, 0)),
        ),
        compiler_params=pltpu.CompilerParams(
            dimension_semantics=("parallel", "arbitrary"),
            vmem_limit_bytes=32 * 1024 * 1024),
    )(src, tgt)

    # Tiny epilogue (once per image): collapse the (8,128) partial slabs,
    # combine pseudo-split halves, divide by the TRUE element count and apply
    # the log.  mse == 0 yields -inf, matching the PyTorch reference.
    sse = jnp.sum(sse_slabs, axis=(1, 2))
    if split > 1:
        sse = jnp.sum(sse.reshape(-1, split), axis=1)
    mse = sse / float(N)
    loss = -10.0 * jnp.log10((float(max_val) ** 2) / mse)
    return loss.reshape(lead)


def psnr_loss_ref(source, target, max_val: float = 256.0):
    """Pure-JAX reference mirroring the PyTorch code."""
    diff = source.astype(jnp.float32) - target.astype(jnp.float32)
    mse = jnp.mean(diff * diff, axis=(-3, -2, -1))
    return -10.0 * jnp.log10(max_val ** 2 / mse)


if __name__ == "__main__":
    key = jax.random.PRNGKey(0)
    keys = jax.random.split(key, 6)

    # Primary case: (B, C, H, W) = (2, 4, 16, 16), values in [0, 256).
    B, C, H, W = 2, 4, 16, 16
    source = jax.random.uniform(keys[0], (B, C, H, W), dtype=jnp.float32) * 256.0
    target = jax.random.uniform(keys[1], (B, C, H, W), dtype=jnp.float32) * 256.0
    out = jax.block_until_ready(psnr_loss(source, target))
    expected = psnr_loss_ref(source, target)
    np.testing.assert_allclose(np.asarray(out), np.asarray(expected),
                               rtol=1e-4, atol=1e-4)

    # Lane-unaligned + extra leading dims (exercises the lane-alignment pad).
    s2 = jax.random.uniform(keys[2], (2, 3, 3, 7, 9), dtype=jnp.float32) * 256.0
    t2 = jax.random.uniform(keys[3], (2, 3, 3, 7, 9), dtype=jnp.float32) * 256.0
    out2 = jax.block_until_ready(psnr_loss(s2, t2))
    np.testing.assert_allclose(np.asarray(out2), np.asarray(psnr_loss_ref(s2, t2)),
                               rtol=1e-4, atol=1e-4)

    # Single image, aligned but rows not a multiple of the tile: exercises the
    # dual-core pseudo-split, the partial row block and the in-kernel mask.
    s3 = jax.random.uniform(keys[4], (1, 2, 36, 64), dtype=jnp.float32) * 256.0
    t3 = jax.random.uniform(keys[5], (1, 2, 36, 64), dtype=jnp.float32) * 256.0
    out3 = jax.block_until_ready(psnr_loss(s3, t3))
    np.testing.assert_allclose(np.asarray(out3), np.asarray(psnr_loss_ref(s3, t3)),
                               rtol=1e-4, atol=1e-4)

    print("KERNEL_OK")
</pallas_src>

<mosaic_0001>
module attributes {stable_mosaic.version = 11 : i64} {
  func.func @_sse_kernel(%arg0: i32, %arg1: i32, %arg2: memref<1x8x128xf32, #tpu.memory_space<vmem>>, %arg3: memref<1x8x128xf32, #tpu.memory_space<vmem>>, %arg4: memref<1x8x128xf32, #tpu.memory_space<vmem>>) attributes {dimension_semantics = [#tpu.dimension_semantics<parallel>, #tpu.dimension_semantics<arbitrary>], iteration_bounds = array<i64: 2, 1>, scalar_prefetch = 0 : i64, scratch_operands = 0 : i64, tpu.core_type = #tpu.core_type<tc>, window_params = [{transform_indices = @transform_0, window_bounds = array<i64: 1, 8, 128>}, {transform_indices = @transform_1, window_bounds = array<i64: 1, 8, 128>}, {transform_indices = @transform_2, window_bounds = array<i64: 1, 8, 128>}]} {
    %c0_i32 = arith.constant 0 : i32
    %0 = arith.cmpi eq, %arg1, %c0_i32 : i32
    %1 = arith.extui %0 : i1 to i32
    %c0_i32_0 = arith.constant 0 : i32
    %2 = arith.cmpi ne, %1, %c0_i32_0 : i32
    scf.if %2 {
      %cst_12 = arith.constant 0.000000e+00 : f32
      %12 = vector.broadcast %cst_12 : f32 to vector<1x8x128xf32>
      %c0_13 = arith.constant 0 : index
      %c0_14 = arith.constant 0 : index
      %c0_15 = arith.constant 0 : index
      %13 = vector.load %arg4[%c0_13, %c0_14, %c0_15] : memref<1x8x128xf32, #tpu.memory_space<vmem>>, vector<1x8x128xf32>
      tpu.vector_store %arg4[%c0_13, %c0_14, %c0_15], %12 {strides = array<i32>} : memref<1x8x128xf32, #tpu.memory_space<vmem>>, vector<1x8x128xf32>,
    } else {
    }
    %c0 = arith.constant 0 : index
    %c0_1 = arith.constant 0 : index
    %c0_2 = arith.constant 0 : index
    %3 = vector.load %arg2[%c0, %c0_1, %c0_2] : memref<1x8x128xf32, #tpu.memory_space<vmem>>, vector<1x8x128xf32>
    %c0_3 = arith.constant 0 : index
    %c0_4 = arith.constant 0 : index
    %c0_5 = arith.constant 0 : index
    %4 = vector.load %arg3[%c0_3, %c0_4, %c0_5] : memref<1x8x128xf32, #tpu.memory_space<vmem>>, vector<1x8x128xf32>
    %5 = arith.subf %3, %4 : vector<1x8x128xf32>
    %6 = arith.mulf %5, %5 : vector<1x8x128xf32>
    %7 = vector.shape_cast %6 : vector<1x8x128xf32> to vector<1x1x8x128xf32>
    %cst = arith.constant dense<0.000000e+00> : vector<1x8x128xf32>
    %8 = vector.multi_reduction <add>, %7, %cst [1] : vector<1x1x8x128xf32> to vector<1x8x128xf32>
    %c0_6 = arith.constant 0 : index
    %c0_7 = arith.constant 0 : index
    %c0_8 = arith.constant 0 : index
    %9 = vector.load %arg4[%c0_6, %c0_7, %c0_8] : memref<1x8x128xf32, #tpu.memory_space<vmem>>, vector<1x8x128xf32>
    %10 = arith.addf %9, %8 : vector<1x8x128xf32>
    %c0_9 = arith.constant 0 : index
    %c0_10 = arith.constant 0 : index
    %c0_11 = arith.constant 0 : index
    %11 = vector.load %arg4[%c0_9, %c0_10, %c0_11] : memref<1x8x128xf32, #tpu.memory_space<vmem>>, vector<1x8x128xf32>
    tpu.vector_store %arg4[%c0_9, %c0_10, %c0_11], %10 {strides = array<i32>} : memref<1x8x128xf32, #tpu.memory_space<vmem>>, vector<1x8x128xf32>,
    return
  }
  func.func @transform_0(%arg0: i32, %arg1: i32) -> (i32, i32, i32) {
    %c0_i32 = arith.constant 0 : i32
    %c0_i32_0 = arith.constant 0 : i32
    return %arg0, %arg1, %c0_i32 : i32, i32, i32
  }
  func.func @transform_1(%arg0: i32, %arg1: i32) -> (i32, i32, i32) {
    %c0_i32 = arith.constant 0 : i32
    %c0_i32_0 = arith.constant 0 : i32
    return %arg0, %arg1, %c0_i32 : i32, i32, i32
  }
  func.func @transform_2(%arg0: i32, %arg1: i32) -> (i32, i32, i32) {
    %c0_i32 = arith.constant 0 : i32
    %c0_i32_0 = arith.constant 0 : i32
    %c0_i32_1 = arith.constant 0 : i32
    return %arg0, %c0_i32, %c0_i32_0 : i32, i32, i32
  }
}

</mosaic_0001>

<bundles_post_ra>
// kernel: psnr_loss.1
= control target key start
LH: loop header
LB: loop body
LE: loop exit
PB: predicated region body
PF: predicated region fallthrough
CT: control target
= control target key end

     0   :  { %s356_s9 = smov 0   ;;  %s358_s10 = smov 0   ;;  %s380_s0 = inlined_call_operand.vmem [shape: f32[2,8,128], index: 0, kind: input, shape index: {}]   ;;  %s381_s1 = inlined_call_operand.vmem [shape: f32[2,8,128], index: 1, kind: input, shape index: {}]   ;;  %s382_s2 = inlined_call_operand.vmem [shape: f32[2,8,128], index: 2, kind: output, shape index: {}]  }
   0x1   :  { %s360_s11 = smov 0  }
   0x2 LB: > { %s24_s12 = sadd.s32 1, %s335_s10  ;;  %p286_p0 = scmp.ge.s32.totalorder %s339_s11, 1  ;;  %s339_s11 = sphi %s360_s11, %s12_s11   ;;  %s335_s10 = sphi %s358_s10, %s384_s10   ;;  %s331_s9 = sphi %s356_s9, %s383_s9  }
   0x3   : > { %p26_p1 = scmp.ge.s32.totalorder %s24_s12, 2  ;;  %p142_p2 = scmp.lt.s32.totalorder %s339_s11, 3 }
   0x5   : > { %s386_s12 = smov (%p26_p1, %s24_s12), 0  ;;  %p143_p3 = pnand %p286_p0, %p142_p2 }
   0x6   : > { %p172_p4 = scmp.lt.s32.totalorder (!%p143_p3), %s331_s9, 1 }
   0x7   : > { %146 = sbr.rel (%p143_p3) target bundleno = 22 (0x16), region = 28 }
   0xc   : > { %s388_s9 = smov (!%p172_p4, %s331_s9), 1 }
   0xd   : > { %s287_s13 = sshll.u32 %s388_s9, 3 }
   0xe   : > { %s178_s16 = scalar_lea.vmem %s380_s0, %s287_s13  ;;  %s185_s19 = scalar_lea.vmem %s381_s1, %s287_s13 }
   0xf   : > { %v195_v0 = vld [vmem:[%s178_s16] sm:$0xff]  ;;  %s189_s22 = scalar_lea.vmem %s382_s2, %s287_s13 }
  0x10   : > { %v196_v1 = vld [vmem:[%s185_s19] sm:$0xff] }
  0x11   : > { %v197_v2 = vsub.f32 %v195_v0, %v196_v1 }
  0x13   : > { %v198_v3 = vmul.f32 %v197_v2, %v197_v2 }
  0x15   : > { %202 = vst [vmem:[%s189_s22] sm:$0xff] %v198_v3 }
  0x16 PF: > { %s12_s11 = sadd.s32 1, %s339_s11   ;;  %s383_s9 = smov %s335_s10 }
  0x17   : > { %p9_p5 = scmp.ge.s32.totalorder %s12_s11, 4   ;;  %s384_s10 = smov %s386_s12 }
  0x19   :  { %11 = sbr.rel (!%p9_p5) target bundleno = 2 (0x2), region = 65 }

</bundles_post_ra>
